<compile_context>
chip_gen: v7x
topology: tpu7x:2x2x1
jax: 0.10.0
libtpu: 0.0.40
codegen_flags: <defaults>
</compile_context>

<pallas_src>
import functools
import math

import jax
import jax.numpy as jnp
from jax.experimental import pallas as pl
from jax.experimental.pallas import tpu as pltpu


def gaussblack_kernel(x_ref, wbig_ref, w2_ref, b_ref, o_ref, *, K, dil, W):
    """One (Cin, TB*W) slab -> one (Cout, TB*W) slab.

    x_ref    : (Cin, TBW)            compute dtype (bf16/f32); TB rows of width W
                                     flattened on the lane axis.
    wbig_ref : ((K+1)*Cout, Cin)     conv1 taps stacked on the M axis (tap-major),
                                     with the 1x1 downsample weights appended.
    w2_ref   : (K*Cout, Cout)        conv2 taps stacked on the M axis (tap-major).
    b_ref    : (Cout, 3) f32         columns = [b1, b2, b_downsample].
    o_ref    : (Cout, TBW) f32       lane-dense output block.
    """
    x = x_ref[...]                                   # (Cin, TBW)
    TBW = x.shape[1]
    Cout = o_ref.shape[0]
    cdt = x.dtype

    # Position within each logical length-W row (for the causal left boundary and to
    # keep rolls from leaking across row boundaries).
    col = jax.lax.broadcasted_iota(jnp.int32, (1, TBW), 1) % W

    def causal_tap_sum(y):
        """y: (K*Cout, TBW) f32, tap-major rows.  Returns sum_k shift_right(y_k, s_k)
        with per-row causal zero fill (s_k = (K-1-k)*dil)."""
        acc = jnp.zeros((Cout, TBW), jnp.float32)
        for k in range(K):
            s = (K - 1 - k) * dil
            yk = y[k * Cout:(k + 1) * Cout, :]
            if s == 0:
                acc = acc + yk
            else:
                shifted = pltpu.roll(yk, s, 1)        # toward higher lane indices
                acc = acc + jnp.where(col >= s, shifted, 0.0)
        return acc

    # ---- conv1 (all K taps) + 1x1 residual: ONE fused MXU matmul ----
    y1 = jnp.dot(wbig_ref[...], x, preferred_element_type=jnp.float32)
    h1 = jnp.tanh(causal_tap_sum(y1[:K * Cout, :]) + b_ref[:, 0:1])
    res = y1[K * Cout:, :] + b_ref[:, 2:3]
    # dropout1: identity at inference

    # ---- conv2 (all K taps): ONE fused MXU matmul ----
    y2 = jnp.dot(w2_ref[...], h1.astype(cdt), preferred_element_type=jnp.float32)
    h2 = jnp.tanh(causal_tap_sum(y2) + b_ref[:, 1:2])
    # dropout2: identity at inference

    # ---- residual add + final ReLU ----
    o_ref[...] = jnp.maximum(h2 + res, 0.0)


def gauss_black_forward(x, w1, b1, w2, b2, wd, bd, *, kernel_size, dilation_w,
                        row_block=None, compute_dtype=jnp.bfloat16,
                        target_block_lanes=2048):
    """x: (N, Cin, H, W) NCHW; conv weights in PyTorch OIHW layout. Returns NCHW f32."""
    N, Cin, H, W = x.shape
    Cout = w1.shape[0]
    K = kernel_size
    NH = N * H

    # Rows per block: TB*W must be a multiple of 128 so every block is lane-dense.
    base = 128 // math.gcd(W, 128)
    if row_block is None:
        row_block = max(1, target_block_lanes // W)
    tb = max(base, (row_block // base) * base)
    nh_base = -(-NH // base) * base
    tb = min(tb, nh_base)                       # don't exceed the (rounded) problem
    nhp = -(-NH // tb) * tb                     # pad row count to a multiple of tb
    grid = nhp // tb
    tbw = tb * W

    # ---- glue: NCHW -> (Cin, NH*W), rows flattened on the lane axis ----
    xr = jnp.transpose(x, (1, 0, 2, 3)).reshape(Cin, NH * W).astype(compute_dtype)
    if nhp != NH:
        xr = jnp.pad(xr, ((0, 0), (0, (nhp - NH) * W)))

    # ---- weights: stack conv taps (and the 1x1 residual) along the M axis ----
    w1t = jnp.transpose(w1[:, :, 0, :], (2, 0, 1)).reshape(K * Cout, Cin)
    wbig = jnp.concatenate([w1t, wd[:, :, 0, 0]], axis=0).astype(compute_dtype)
    w2t = jnp.transpose(w2[:, :, 0, :], (2, 0, 1)).reshape(K * Cout, Cout).astype(compute_dtype)
    b_all = jnp.stack([b1, b2, bd], axis=1).astype(jnp.float32)          # (Cout, 3)

    # Rough per-step VMEM need (double-buffered I/O + in-kernel temporaries), so larger
    # row blocks still compile on v5e's 16 MiB default scoped VMEM and stay inside
    # v7x's 64 MiB physical VMEM.
    itemsize = jnp.dtype(compute_dtype).itemsize
    block_bytes = (2 * (Cin * tbw * itemsize + Cout * tbw * 4)
                   + (2 * K + 6) * Cout * tbw * 4
                   + ((K + 1) * Cout * Cin + K * Cout * Cout) * itemsize
                   + Cout * 3 * 4)
    vmem_limit = int(min(max(2 * block_bytes, 16 * 1024 * 1024), 64 * 1024 * 1024))

    kernel = functools.partial(gaussblack_kernel, K=K, dil=dilation_w, W=W)

    out = pl.pallas_call(
        kernel,
        out_shape=jax.ShapeDtypeStruct((Cout, nhp * W), jnp.float32),
        grid_spec=pltpu.PrefetchScalarGridSpec(
            num_scalar_prefetch=0,
            grid=(grid,),
            in_specs=[
                pl.BlockSpec((Cin, tbw), lambda b: (0, b)),               # x row slab
                pl.BlockSpec(((K + 1) * Cout, Cin), lambda b: (0, 0)),    # conv1+res W
                pl.BlockSpec((K * Cout, Cout), lambda b: (0, 0)),         # conv2 W
                pl.BlockSpec((Cout, 3), lambda b: (0, 0)),                # packed biases
            ],
            out_specs=pl.BlockSpec((Cout, tbw), lambda b: (0, b)),
        ),
        compiler_params=pltpu.CompilerParams(
            dimension_semantics=("parallel",),
            vmem_limit_bytes=vmem_limit),
    )(xr, wbig, w2t, b_all)

    out = out[:, :NH * W].reshape(Cout, N, H, W)
    return jnp.transpose(out, (1, 0, 2, 3))


# ----------------------------- helpers / reference -----------------------------

def apply_weight_norm(v, g):
    """PyTorch weight_norm (dim=0): w = g * v / ||v||, norm per output channel."""
    norm = jnp.sqrt(jnp.sum(v * v, axis=(1, 2, 3), keepdims=True))
    return g.reshape(-1, 1, 1, 1) * v / norm


def reference_forward(x, w1, b1, w2, b2, wd, bd, *, dilation_w, pad,
                      compute_dtype=jnp.float32):
    """Pure-JAX reference matching the PyTorch module (NCHW, OIHW).

    `compute_dtype` mirrors the kernel's matmul-operand precision (operands rounded to
    it, accumulation in f32), so the bf16 kernel can be checked against a numerically
    equivalent reference.
    """
    rnd = lambda a: a.astype(compute_dtype).astype(jnp.float32)

    def conv(inp, w, b, dil, pw):
        y = jax.lax.conv_general_dilated(
            rnd(inp), rnd(w), window_strides=(1, 1),
            padding=((0, 0), (pw, pw)),
            rhs_dilation=(1, dil),
            dimension_numbers=("NCHW", "OIHW", "NCHW"),
            preferred_element_type=jnp.float32)
        return y + b.reshape(1, -1, 1, 1)

    out = conv(x, w1, b1, dilation_w, pad)
    if pad:
        out = out[:, :, :, :-pad]                     # Chomp2d
    out = jnp.tanh(out)
    out = conv(out, w2, b2, dilation_w, pad)
    if pad:
        out = out[:, :, :, :-pad]                     # Chomp2d
    out = jnp.tanh(out)
    res = conv(x, wd, bd, 1, 0)                       # 1x1 downsample
    return jnp.maximum(out + res, 0.0)


if __name__ == "__main__":
    N, Cin, Cout, H, W = 2, 4, 8, 8, 16
    K, DIL = 3, 2
    PAD = (K - 1) * DIL   # padding=(0, PAD) in the PyTorch module

    key = jax.random.PRNGKey(0)
    ks = jax.random.split(key, 9)
    x = jax.random.normal(ks[0], (N, Cin, H, W), jnp.float32)

    # deterministic synthetic parameters (conv weights ~ N(0, 0.01) as in init_weights)
    v1 = jax.random.normal(ks[1], (Cout, Cin, 1, K), jnp.float32) * 0.01
    g1 = jnp.abs(jax.random.normal(ks[2], (Cout,), jnp.float32)) + 0.5
    b1 = jax.random.normal(ks[3], (Cout,), jnp.float32) * 0.1
    v2 = jax.random.normal(ks[4], (Cout, Cout, 1, K), jnp.float32) * 0.01
    g2 = jnp.abs(jax.random.normal(ks[5], (Cout,), jnp.float32)) + 0.5
    b2 = jax.random.normal(ks[6], (Cout,), jnp.float32) * 0.1
    wd = jax.random.normal(ks[7], (Cout, Cin, 1, 1), jnp.float32) * 0.01
    bd = jax.random.normal(ks[8], (Cout,), jnp.float32) * 0.1

    # weight_norm applied to conv1/conv2 (downsample is a plain conv)
    w1 = apply_weight_norm(v1, g1)
    w2 = apply_weight_norm(v2, g2)

    # exact-precision path (f32 operands) with a multi-step grid (row_block=8 -> 2 steps)
    y32 = gauss_black_forward(x, w1, b1, w2, b2, wd, bd,
                              kernel_size=K, dilation_w=DIL,
                              compute_dtype=jnp.float32, row_block=8)
    y32 = jax.block_until_ready(y32)
    ref32 = reference_forward(x, w1, b1, w2, b2, wd, bd, dilation_w=DIL, pad=PAD)
    assert y32.shape == (N, Cout, H, W), y32.shape
    err32 = float(jnp.max(jnp.abs(y32 - ref32)))
    assert err32 < 1e-3, f"f32 mismatch vs reference: {err32}"

    # fast path: bf16 matmul operands (halved HBM read traffic), f32 accumulation
    ybf = gauss_black_forward(x, w1, b1, w2, b2, wd, bd,
                              kernel_size=K, dilation_w=DIL,
                              compute_dtype=jnp.bfloat16)
    ybf = jax.block_until_ready(ybf)
    refbf = reference_forward(x, w1, b1, w2, b2, wd, bd, dilation_w=DIL, pad=PAD,
                              compute_dtype=jnp.bfloat16)
    assert ybf.shape == (N, Cout, H, W), ybf.shape
    errbf = float(jnp.max(jnp.abs(ybf - refbf)))
    assert errbf < 2e-3, f"bf16 mismatch vs reference: {errbf}"

    print("KERNEL_OK")
</pallas_src>

<mosaic_0001>
module attributes {stable_mosaic.version = 11 : i64} {
  func.func @gaussblack_kernel(%arg0: i32, %arg1: memref<4x128xf32, #tpu.memory_space<vmem>>, %arg2: memref<32x4xf32, #tpu.memory_space<vmem>>, %arg3: memref<24x8xf32, #tpu.memory_space<vmem>>, %arg4: memref<8x3xf32, #tpu.memory_space<vmem>>, %arg5: memref<8x128xf32, #tpu.memory_space<vmem>>) attributes {dimension_semantics = [#tpu.dimension_semantics<parallel>], iteration_bounds = array<i64: 2>, scalar_prefetch = 0 : i64, scratch_operands = 0 : i64, tpu.core_type = #tpu.core_type<tc>, window_params = [{transform_indices = @transform_0, window_bounds = array<i64: 4, 128>}, {pipeline_mode = #tpu.pipeline_mode<synchronous>, transform_indices = @transform_1, window_bounds = array<i64: 32, 4>}, {pipeline_mode = #tpu.pipeline_mode<synchronous>, transform_indices = @transform_2, window_bounds = array<i64: 24, 8>}, {pipeline_mode = #tpu.pipeline_mode<synchronous>, transform_indices = @transform_3, window_bounds = array<i64: 8, 3>}, {transform_indices = @transform_4, window_bounds = array<i64: 8, 128>}]} {
    %c0 = arith.constant 0 : index
    %c0_0 = arith.constant 0 : index
    %0 = vector.load %arg1[%c0, %c0_0] : memref<4x128xf32, #tpu.memory_space<vmem>>, vector<4x128xf32>
    %1 = tpu.iota {dimensions = array<i32: 1>} : vector<1x128xi32>
    %c16_i32 = arith.constant 16 : i32
    %c0_i32 = arith.constant 0 : i32
    %2 = arith.cmpi eq, %c16_i32, %c0_i32 : i32
    %c1_i32 = arith.constant 1 : i32
    %3 = arith.select %2, %c1_i32, %c16_i32 : i32
    %4 = vector.broadcast %3 : i32 to vector<1x128xi32>
    %5 = arith.remsi %1, %4 : vector<1x128xi32>
    %c0_i32_1 = arith.constant 0 : i32
    %6 = vector.broadcast %c0_i32_1 : i32 to vector<1x128xi32>
    %7 = arith.cmpi ne, %5, %6 : vector<1x128xi32>
    %c0_i32_2 = arith.constant 0 : i32
    %8 = vector.broadcast %c0_i32_2 : i32 to vector<1x128xi32>
    %9 = arith.cmpi slt, %5, %8 : vector<1x128xi32>
    %c0_i32_3 = arith.constant 0 : i32
    %10 = arith.cmpi slt, %3, %c0_i32_3 : i32
    %11 = vector.broadcast %10 : i1 to vector<1x128xi1>
    %12 = vector.broadcast %11 : vector<1x128xi1> to vector<1x128xi1>
    %13 = arith.xori %9, %12 : vector<1x128xi1>
    %14 = arith.andi %13, %7 : vector<1x128xi1>
    %15 = vector.broadcast %3 : i32 to vector<1x128xi32>
    %16 = arith.addi %5, %15 : vector<1x128xi32>
    %17 = arith.select %14, %16, %5 : vector<1x128xi1>, vector<1x128xi32>
    %c0_4 = arith.constant 0 : index
    %c0_5 = arith.constant 0 : index
    %18 = vector.load %arg2[%c0_4, %c0_5] : memref<32x4xf32, #tpu.memory_space<vmem>>, vector<32x4xf32>
    %cst = arith.constant dense<0.000000e+00> : vector<32x128xf32>
    %19 = tpu.matmul %18, %0, %cst {dimension_numbers = #tpu.dot_dimension_numbers<[1], [0], [0], [1], [0, 0, 1, 1], [], []>} : vector<32x4xf32>, vector<4x128xf32>, vector<32x128xf32> -> vector<32x128xf32>
    %20 = vector.extract_strided_slice %19 {offsets = [0, 0], sizes = [24, 128], strides = [1, 1]} : vector<32x128xf32> to vector<24x128xf32>
    %cst_6 = arith.constant 0.000000e+00 : f32
    %21 = vector.broadcast %cst_6 : f32 to vector<8x128xf32>
    %22 = vector.extract_strided_slice %20 {offsets = [0, 0], sizes = [8, 128], strides = [1, 1]} : vector<24x128xf32> to vector<8x128xf32>
    %c4_i32 = arith.constant 4 : i32
    %23 = tpu.dynamic_rotate %22 by %c4_i32 dim 1 : vector<8x128xf32>, i32 -> vector<8x128xf32>
    %c4_i32_7 = arith.constant 4 : i32
    %24 = vector.broadcast %c4_i32_7 : i32 to vector<1x128xi32>
    %25 = arith.cmpi sge, %17, %24 : vector<1x128xi32>
    %cst_8 = arith.constant 0.000000e+00 : f32
    %26 = vector.shape_cast %25 : vector<1x128xi1> to vector<1x128xi1>
    %27 = vector.broadcast %26 : vector<1x128xi1> to vector<8x128xi1>
    %28 = vector.broadcast %cst_8 : f32 to vector<8x128xf32>
    %29 = arith.select %27, %23, %28 : vector<8x128xi1>, vector<8x128xf32>
    %30 = arith.addf %21, %29 : vector<8x128xf32>
    %31 = vector.extract_strided_slice %20 {offsets = [8, 0], sizes = [8, 128], strides = [1, 1]} : vector<24x128xf32> to vector<8x128xf32>
    %c2_i32 = arith.constant 2 : i32
    %32 = tpu.dynamic_rotate %31 by %c2_i32 dim 1 : vector<8x128xf32>, i32 -> vector<8x128xf32>
    %c2_i32_9 = arith.constant 2 : i32
    %33 = vector.broadcast %c2_i32_9 : i32 to vector<1x128xi32>
    %34 = arith.cmpi sge, %17, %33 : vector<1x128xi32>
    %cst_10 = arith.constant 0.000000e+00 : f32
    %35 = vector.shape_cast %34 : vector<1x128xi1> to vector<1x128xi1>
    %36 = vector.broadcast %35 : vector<1x128xi1> to vector<8x128xi1>
    %37 = vector.broadcast %cst_10 : f32 to vector<8x128xf32>
    %38 = arith.select %36, %32, %37 : vector<8x128xi1>, vector<8x128xf32>
    %39 = arith.addf %30, %38 : vector<8x128xf32>
    %40 = vector.extract_strided_slice %20 {offsets = [16, 0], sizes = [8, 128], strides = [1, 1]} : vector<24x128xf32> to vector<8x128xf32>
    %41 = arith.addf %39, %40 : vector<8x128xf32>
    %c0_11 = arith.constant 0 : index
    %c0_12 = arith.constant 0 : index
    %42 = vector.load %arg4[%c0_11, %c0_12] : memref<8x3xf32, #tpu.memory_space<vmem>>, vector<8x1xf32>
    %43 = vector.broadcast %42 : vector<8x1xf32> to vector<8x128xf32>
    %44 = arith.addf %41, %43 : vector<8x128xf32>
    %45 = math.tanh %44 : vector<8x128xf32>
    %46 = vector.extract_strided_slice %19 {offsets = [24, 0], sizes = [8, 128], strides = [1, 1]} : vector<32x128xf32> to vector<8x128xf32>
    %c0_13 = arith.constant 0 : index
    %c2 = arith.constant 2 : index
    %47 = vector.load %arg4[%c0_13, %c2] : memref<8x3xf32, #tpu.memory_space<vmem>>, vector<8x1xf32>
    %48 = vector.broadcast %47 : vector<8x1xf32> to vector<8x128xf32>
    %49 = arith.addf %46, %48 : vector<8x128xf32>
    %c0_14 = arith.constant 0 : index
    %c0_15 = arith.constant 0 : index
    %50 = vector.load %arg3[%c0_14, %c0_15] : memref<24x8xf32, #tpu.memory_space<vmem>>, vector<24x8xf32>
    %cst_16 = arith.constant dense<0.000000e+00> : vector<24x128xf32>
    %51 = tpu.matmul %50, %45, %cst_16 {dimension_numbers = #tpu.dot_dimension_numbers<[1], [0], [0], [1], [0, 0, 1, 1], [], []>} : vector<24x8xf32>, vector<8x128xf32>, vector<24x128xf32> -> vector<24x128xf32>
    %cst_17 = arith.constant 0.000000e+00 : f32
    %52 = vector.broadcast %cst_17 : f32 to vector<8x128xf32>
    %53 = vector.extract_strided_slice %51 {offsets = [0, 0], sizes = [8, 128], strides = [1, 1]} : vector<24x128xf32> to vector<8x128xf32>
    %c4_i32_18 = arith.constant 4 : i32
    %54 = tpu.dynamic_rotate %53 by %c4_i32_18 dim 1 : vector<8x128xf32>, i32 -> vector<8x128xf32>
    %c4_i32_19 = arith.constant 4 : i32
    %55 = vector.broadcast %c4_i32_19 : i32 to vector<1x128xi32>
    %56 = arith.cmpi sge, %17, %55 : vector<1x128xi32>
    %cst_20 = arith.constant 0.000000e+00 : f32
    %57 = vector.shape_cast %56 : vector<1x128xi1> to vector<1x128xi1>
    %58 = vector.broadcast %57 : vector<1x128xi1> to vector<8x128xi1>
    %59 = vector.broadcast %cst_20 : f32 to vector<8x128xf32>
    %60 = arith.select %58, %54, %59 : vector<8x128xi1>, vector<8x128xf32>
    %61 = arith.addf %52, %60 : vector<8x128xf32>
    %62 = vector.extract_strided_slice %51 {offsets = [8, 0], sizes = [8, 128], strides = [1, 1]} : vector<24x128xf32> to vector<8x128xf32>
    %c2_i32_21 = arith.constant 2 : i32
    %63 = tpu.dynamic_rotate %62 by %c2_i32_21 dim 1 : vector<8x128xf32>, i32 -> vector<8x128xf32>
    %c2_i32_22 = arith.constant 2 : i32
    %64 = vector.broadcast %c2_i32_22 : i32 to vector<1x128xi32>
    %65 = arith.cmpi sge, %17, %64 : vector<1x128xi32>
    %cst_23 = arith.constant 0.000000e+00 : f32
    %66 = vector.shape_cast %65 : vector<1x128xi1> to vector<1x128xi1>
    %67 = vector.broadcast %66 : vector<1x128xi1> to vector<8x128xi1>
    %68 = vector.broadcast %cst_23 : f32 to vector<8x128xf32>
    %69 = arith.select %67, %63, %68 : vector<8x128xi1>, vector<8x128xf32>
    %70 = arith.addf %61, %69 : vector<8x128xf32>
    %71 = vector.extract_strided_slice %51 {offsets = [16, 0], sizes = [8, 128], strides = [1, 1]} : vector<24x128xf32> to vector<8x128xf32>
    %72 = arith.addf %70, %71 : vector<8x128xf32>
    %c0_24 = arith.constant 0 : index
    %c1 = arith.constant 1 : index
    %73 = vector.load %arg4[%c0_24, %c1] : memref<8x3xf32, #tpu.memory_space<vmem>>, vector<8x1xf32>
    %74 = vector.broadcast %73 : vector<8x1xf32> to vector<8x128xf32>
    %75 = arith.addf %72, %74 : vector<8x128xf32>
    %76 = math.tanh %75 : vector<8x128xf32>
    %77 = arith.addf %76, %49 : vector<8x128xf32>
    %cst_25 = arith.constant 0.000000e+00 : f32
    %78 = vector.broadcast %cst_25 : f32 to vector<8x128xf32>
    %79 = arith.maximumf %77, %78 : vector<8x128xf32>
    %c0_26 = arith.constant 0 : index
    %c0_27 = arith.constant 0 : index
    %80 = vector.load %arg5[%c0_26, %c0_27] : memref<8x128xf32, #tpu.memory_space<vmem>>, vector<8x128xf32>
    tpu.vector_store %arg5[%c0_26, %c0_27], %79 {strides = array<i32>} : memref<8x128xf32, #tpu.memory_space<vmem>>, vector<8x128xf32>,
    return
  }
  func.func @transform_0(%arg0: i32) -> (i32, i32) {
    %c0_i32 = arith.constant 0 : i32
    %c0_i32_0 = arith.constant 0 : i32
    return %c0_i32, %arg0 : i32, i32
  }
  func.func @transform_1(%arg0: i32) -> (i32, i32) {
    %c0_i32 = arith.constant 0 : i32
    %c0_i32_0 = arith.constant 0 : i32
    %c0_i32_1 = arith.constant 0 : i32
    return %c0_i32, %c0_i32_0 : i32, i32
  }
  func.func @transform_2(%arg0: i32) -> (i32, i32) {
    %c0_i32 = arith.constant 0 : i32
    %c0_i32_0 = arith.constant 0 : i32
    %c0_i32_1 = arith.constant 0 : i32
    return %c0_i32, %c0_i32_0 : i32, i32
  }
  func.func @transform_3(%arg0: i32) -> (i32, i32) {
    %c0_i32 = arith.constant 0 : i32
    %c0_i32_0 = arith.constant 0 : i32
    %c0_i32_1 = arith.constant 0 : i32
    return %c0_i32, %c0_i32_0 : i32, i32
  }
  func.func @transform_4(%arg0: i32) -> (i32, i32) {
    %c0_i32 = arith.constant 0 : i32
    %c0_i32_0 = arith.constant 0 : i32
    return %c0_i32, %arg0 : i32, i32
  }
}

</mosaic_0001>

<bundles_post_ra>
// kernel: tpu_custom_call.1
= control target key start
LH: loop header
LB: loop body
LE: loop exit
PB: predicated region body
PF: predicated region fallthrough
CT: control target
= control target key end

     0   :  { %9 = vsyncpa [#allocation3], 0  ;;  %s874_s0 = inlined_call_operand.vmem [shape: f32[4,256], index: 0, kind: input, shape index: {}]   ;;  %s875_s1 = inlined_call_operand.vmem [shape: f32[32,4], index: 1, kind: input, shape index: {}]   ;;  %s876_s2 = inlined_call_operand.vmem [shape: f32[24,8], index: 2, kind: input, shape index: {}]   ;;  %s877_s3 = inlined_call_operand.vmem [shape: f32[8,3], index: 3, kind: input, shape index: {}]   ;;  %s878_s4 = inlined_call_operand.hbm [shape: f32[8,256], index: 4, kind: output, shape index: {}]  }
   0x1   :  { %11 = vsyncpa [#allocation3 + $0x1], 0  ;;  %s723_s15 = smov 0   ;;  %s725_s16 = smov 0  }
   0x2   :  { %s727_s17 = smov 0   ;;  %s729_s18 = smov 0  }
   0x3 LB: > { %s744_s19 = sadd.s32 4294967295, %s688_s18   ;;  %s526_s20 = sadd.s32 4294967294, %s688_s18   ;;  %s688_s18 = sphi %s729_s18, %s888_s18   ;;  %s684_s17 = sphi %s727_s17, %s887_s17   ;;  %s680_s16 = sphi %s725_s16, %s886_s16   ;;  %s676_s15 = sphi %s723_s15, %s885_s15  }
   0x4   : > { %s748_s21 = sadd.s32 1, %s688_s18   ;;  %s113_s22 = sadd.s32 1, %s684_s17 }
   0x5   : > { %s110_s23 = ssub.s32 %s688_s18, %s748_s21  ;;  %p123_p0 = scmp.ne.s32.totalorder %s684_s17, %s680_s16 }
   0x6   : > { %p111_p1 = scmp.eq.s32.totalorder %s110_s23, 0  ;;  %p124_p2 = scmp.eq.s32.totalorder %s744_s19, 1 }
   0x7   : > { %p129_p3 = scmp.ne.s32.totalorder %s680_s16, %s676_s15  ;;  %p130_p4 = scmp.eq.s32.totalorder %s526_s20, 1 }
   0x8   : > { %s759_s24 = scalar_select %p111_p1, %s684_s17, %s113_s22  }
   0x9   : > { %p761_p5 = por %p124_p2, %p123_p0  ;;  %p765_p6 = por %p130_p4, %p129_p3 }
   0xa   : > { %p529_p7 = scmp.ge.s32.totalorder %s688_s18, 1  ;;  %p164_p8 = scmp.lt.s32.totalorder %s688_s18, 3 }
   0xc   : > { %p165_p9 = pnand %p529_p7, %p164_p8 }
   0xd   : > { %p189_p10 = scmp.lt.s32.totalorder (!%p165_p9), %s744_s19, 1  ;;  %v208_v0 = vld [vmem:[%s875_s1] sm:$0xff] (!%p165_p9)  ;;  %vm212_vm0 = vcmask (!%p165_p9), 31744   ;;  %v690_v2 = vmov (!%p165_p9), 0   ;;  %vm225_vm1 = vcmask (!%p165_p9), 1043456   ;;  %v209_v4 = vld [vmem:[%s875_s1 + $0x8] sm:$0xff] (!%p165_p9)  ;;  %v194_v13 = vlaneseq (!%p165_p9) }
   0xe   : > { %168 = sbr.rel (%p165_p9) target bundleno = 742 (0x2e6), region = 36  ;;  %555 = vmatprep.mubr.msk.f32.mxu0 (!%p165_p9), %vm212_vm0, %v208_v0  ;;  %v329_v1 = vld [vmem:[%s877_s3] sm:$0xff] (!%p165_p9)  ;;  %618 = vset.pattern.permute.xlu0 (!%p165_p9), %v690_v2  ;;  %v210_v5 = vld [vmem:[%s875_s1 + $0x10] sm:$0xff] (!%p165_p9)  ;;  %v211_v6 = vld [vmem:[%s875_s1 + $0x18] sm:$0xff] (!%p165_p9)  ;;  %v691_v7 = vmov (!%p165_p9), 0.0   ;;  %s692_s22 = smov (!%p165_p9), 2  }
   0xf   : > { %332 = vperm.xlu0 (!%p165_p9), %618, %v329_v1   ;;  %561 = vmatprep.subr.mxu1 (!%p165_p9), %v691_v7  ;;  %s693_s23 = smov (!%p165_p9), 4   ;;  %vm694_vm2 = vmmov (!%p165_p9), 0   ;;  %v695_v12 = vmov (!%p165_p9), 1   ;;  %v195_v14 = vand.u32 (!%p165_p9), 127, %v194_v13  ;;  %v342_v26 = vld [vmem:[%s876_s2] sm:$0xff] (!%p165_p9)  ;;  %vm345_vm5 = vcmask (!%p165_p9), 64512  }
  0x10   : > { %563 = vmatprep.mubr.msk.f32.mxu1 (!%p165_p9), %vm694_vm2, %v691_v7  ;;  %619 = vset.pattern.permute.xlu1 (!%p165_p9), %v695_v12  ;;  %v343_v28 = vld [vmem:[%s876_s2 + $0x8] sm:$0xff] (!%p165_p9)  ;;  %v344_v29 = vld [vmem:[%s876_s2 + $0x10] sm:$0xff] (!%p165_p9)  ;;  %v696_v30 = vmov (!%p165_p9), 2   ;;  %s186_s7 = sand.u32 (!%p165_p9), 1, %s680_s16  }
  0x11   : > { %v200_v15 = vand.u32 (!%p165_p9), 15, %v195_v14  ;;  %s530_s8 = sshll.u32 (!%p165_p9), %s186_s7, 3  ;;  %s454_s20 = scalar_lea.sflag (!%p165_p9), [#allocation3], %s186_s7 }
  0x12   : > { %s188_s10 = scalar_lea.vmem (!%p165_p9), [#allocation2], %s530_s8 }
  0x13   : > { %vm798_vm3 = vcmp.ge.s32.totalorder (!%p165_p9), %v200_v15, 2  ;;  %vm802_vm4 = vcmp.ge.s32.totalorder (!%p165_p9), %v200_v15, 4  ;;  %620 = vset.pattern.permute.xlu0 (!%p165_p9), %v696_v30  ;;  %s467_s11 = sshll.u32 (!%p165_p9), %s188_s10, 4  ;;  %s834_s11 = int_to_ptr.vmem [resolvable:$true] %s467_s11 }
  0x15   : > { %s190_s5 = scalar_select %p189_p10, %s744_s19, 1 }
  0x17   : > { %s531_s6 = sshll.u32 %s190_s5, 2 }
  0x18   : > { %s192_s9 = scalar_lea.vmem %s874_s0, %s531_s6 }
  0x19   : > { %v193_v3 = vld [vmem:[%s192_s9] sm:$0xf]  ;;  %s541_s9 = sshll.u32 %s744_s19, 7  ;;  %s697_s19 = smov [#allocation2]  }
  0x1a   : > { %553 = vmatprep.subr.msk.mxu0 %vm225_vm1, %v193_v3  ;;  %s832_s14 = scalar_lea.hbm %s878_s4, %s541_s9 }
  0x1b   : > { %554 = vmatpush3.msk.msra.mxu0 %vm225_vm1, %v193_v3 }
  0x1c   : > { %556 = vmatmul.mubr.msk.f32.vlgmr.msra.gmra.mrb[0].mxu0 %vm212_vm0, %v209_v4 }
  0x1d   : > { %558 = vmatprep.mubr.msk.f32.mxu0 %vm212_vm0, %v210_v5 }
  0x20   : > { %559 = vmatmul.mubr.msk.f32.gmra.mrb[2].mxu0 %vm212_vm0, %v211_v6 }
  0x8e   : > { %v333_v16 = vpop.permute.xlu0 %332 }
  0xef   : > { %v557_v8 = vpop.f32.mrb[0].mxu0 }
  0xf0   : > { %321 = vrot.lane.b32.xlu1 %v557_v8, %s692_s22  ;;  %v295_v9 = vpop.f32.mrb[1].mxu0 }
  0xf1   : > { %314 = vrot.lane.b32.xlu0 %v295_v9, %s693_s23 }
  0xf3   : > { %v560_v10 = vpop.f32.mrb[2].mxu0 }
  0xf4   : > { %v305_v11 = vpop.f32.mrb[3].mxu0  ;;  %445 = vperm.xlu1 %619, %v329_v1  }
 0x162   : > { %v322_v19 = vpop.permute.xlu1 %321 }
 0x163   : > { %v326_v20 = vsel %vm798_vm3, %v322_v19, 0.0  ;;  %v315_v21 = vpop.permute.xlu0 %314 }
 0x164   : > { %v319_v22 = vsel %vm802_vm4, %v315_v21, 0.0 }
 0x165   : > { %v327_v23 = vadd.f32 %v326_v20, %v319_v22 }
 0x167   : > { %v328_v24 = vadd.f32 %v327_v23, %v305_v11 }
 0x169   : > { %v335_v25 = vadd.f32 %v333_v16, %v328_v24 }
 0x16b   : > { %622 = vtanh.f32 %v335_v25 }
 0x173   : > { %v446_v37 = vpop.permute.xlu1 %445 }
 0x175   : > { %v623_v27 = vpop.eup %622 }
 0x176   : > { %562 = vmatpush3.msra.mxu1 %v623_v27 }
 0x177   : > { %564 = vmatmul.mubr.msk.f32.vlgmr.msra.gmra.mrb[0].mxu1 %vm345_vm5, %v342_v26 }
 0x178   : > { %566 = vmatprep.mubr.msk.f32.mxu1 %vm694_vm2, %v691_v7 }
 0x17b   : > { %567 = vmatmul.mubr.msk.f32.gmra.mrb[2].mxu1 %vm345_vm5, %v343_v28 }
 0x17c   : > { %569 = vmatprep.mubr.msk.f32.mxu1 %vm694_vm2, %v691_v7 }
 0x17f   : > { %570 = vmatmul.mubr.msk.f32.gmra.mrb[4].mxu1 %vm345_vm5, %v344_v29 }
 0x24a   : > { %v421_v31 = vpop.f32.mrb[0].mxu1 }
 0x24b   : > { %435 = vrot.lane.b32.xlu0 %v421_v31, %s693_s23  ;;  %v565_v32 = vpop.f32.mrb[1].mxu1  ;;  %s630_s23 = sshll.u32 %s697_s19, 4  ;;  %s631_s23 = int_to_ptr.vmem [resolvable:$false] %s630_s23 }
 0x24c   : > { %s632_s27 = scalar_lea.vmem %s631_s23, 256  ;;  %p633_p0 = scmp.lt.s32.totalorder %s834_s11, %s631_s23 }
 0x24e   : > { %v426_v33 = vpop.f32.mrb[2].mxu1 }
 0x24f   : > { %338 = vperm.xlu0 %620, %v329_v1   ;;  %439 = vrot.lane.b32.xlu1 %v426_v33, %s692_s22  ;;  %v568_v34 = vpop.f32.mrb[3].mxu1  ;;  %s626_s22 = scalar_lea.vmem %s834_s11, 128 }
 0x250   : > { %p627_p11 = scmp.ne.s32.totalorder %s834_s11, %s626_s22  ;;  %p634_p1 = scmp.lt.s32.totalorder %s632_s27, %s626_s22 }
 0x252   : > { %v431_v35 = vpop.f32.mrb[4].mxu1  ;;  %p628_p12 = pnand %p627_p11, %p761_p5  ;;  %p635_p2 = por %p634_p1, %p633_p0 }
 0x253   : > { %v571_v36 = vpop.f32.mrb[5].mxu1  ;;  %621 = vset.pattern.permute.xlu0 %v695_v12 }
 0x254   : > { %p629_p13 = pneg %p628_p12 }
 0x256   : > { %p636_p3 = pnand %p635_p2, %p629_p13 }
 0x2bd   : > { %v436_v38 = vpop.permute.xlu0 %435 }
 0x2be   : > { %v437_v40 = vsel %vm802_vm4, %v436_v38, 0.0 }
 0x2c1   : > { %v440_v39 = vpop.permute.xlu1 %439 }
 0x2c2   : > { %v441_v41 = vsel %vm798_vm3, %v440_v39, 0.0 }
 0x2c3   : > { %v442_v42 = vadd.f32 %v441_v41, %v437_v40 }
 0x2c5   : > { %v443_v43 = vadd.f32 %v442_v42, %v431_v35 }
 0x2c7   : > { %v448_v44 = vadd.f32 %v446_v37, %v443_v43 }
 0x2c9   : > { %624 = vtanh.f32 %v448_v44 }
 0x2ce   : > { %v339_v45 = vpop.permute.xlu0 %338 }
 0x2cf   : > { %v341_v46 = vadd.f32 %v560_v10, %v339_v45 }
 0x2d3   : > { %v625_v47 = vpop.eup %624 }
 0x2d4   : > { %v450_v48 = vadd.f32 %v625_v47, %v341_v46 }
 0x2d6   : > { %v451_v49 = vmax.f32 %v450_v48, 0.0 }
 0x2d8   : > { %452 = vst [vmem:[%s188_s10] sm:$0xff] %v451_v49 }
 0x2d9   : > { %639 = shalt.err (!%p636_p3)
}
 0x2da   : > { %s640_s28 = scalar_lea.hbm %s832_s14, 128  ;;  %s644_s5 = scalar_lea.hbm %s878_s4, 256 }
 0x2db   : > { %p641_p4 = scmp.ne.s32.totalorder %s832_s14, %s640_s28  ;;  %p645_p9 = scmp.lt.u32.totalorder %s832_s14, %s878_s4 }
 0x2dc   : > { %p646_p10 = scmp.lt.u32.totalorder %s644_s5, %s640_s28  ;;  %p648_p12 = scmp.lt.u32.totalorder %s640_s28, %s832_s14 }
 0x2dd   : > { %p642_p7 = pnand %p641_p4, %p761_p5 }
 0x2de   : > { %p647_p11 = por %p646_p10, %p645_p9 }
 0x2df   : > { %p643_p8 = pneg %p642_p7 }
 0x2e0   : > { %p649_p13 = por %p648_p12, %p647_p11 }
 0x2e2   : > { %p650_p0 = pnand %p649_p13, %p643_p8 }
 0x2e4   : > { %653 = shalt.err (!%p650_p0)
}
 0x2e5   : > { %572 = dma.vmem_to_hbm [thread:$0]  (%p761_p5), %s834_s11, 128, %s832_s14, %s454_s20  }
 0x2e6 PF: > { %p578_p1 = scmp.ge.s32.totalorder %s688_s18, 2  ;;  %s479_s8 = sand.u32 1, %s676_s15  }
 0x2e7   : > { %s480_s9 = scalar_lea.sflag [#allocation3], %s479_s8 }
 0x2e8   : > { %p575_p2 = pnand %p578_p1, %p765_p6 }
 0x2ea   : > { %671 = dma.done.wait (!%p575_p2), %s480_s9, 128  }
 0x2eb   : > { %673 = vsyncadd (!%p575_p2), %s480_s9, 4294967168  ;;  %p14_p3 = scmp.ge.s32.totalorder %s748_s21, 4   ;;  %s885_s15 = smov %s680_s16 }
 0x2ec   : > { %s886_s16 = smov %s684_s17  ;;  %s887_s17 = smov %s759_s24 }
 0x2ed   : > { %s888_s18 = smov %s748_s21  ;;  %16 = sbr.rel (!%p14_p3) target bundleno = 3 (0x3), region = 71 }
 0x2f4   :  { %485 = vsyncpa [#allocation3], 1 }
 0x2f5   :  { %487 = vsyncpa [#allocation3 + $0x1], 1 }

</bundles_post_ra>
